<compile_context>
chip_gen: v7x
topology: tpu7x:2x2x1
jax: 0.10.0
libtpu: 0.0.40
codegen_flags: <defaults>
</compile_context>

<pallas_src>
import functools

import jax
import jax.numpy as jnp
from jax.experimental import pallas as pl
from jax.experimental.pallas import tpu as pltpu

EPS = 1e-8


def _silu(x):
    return x * jax.nn.sigmoid(x)


def _round_up(v, m):
    return ((v + m - 1) // m) * m


def egnn_edge_kernel(edge_ref, wmat_ref, wcol_ref, out_ref,
                     *, F, H, normalize, tanh):
    """Edges-on-lanes kernel.

    edge_ref: [8+2F, TE]   rows 0:3   = x_src, rows 4:7 = x_dst
                           rows 8:8+F = hh_src, rows 8+F:8+2F = hh_dst
    wmat_ref: [3H+8, W]    rows 0:H   = W1_hh^T  (cols 0:2F)
                           rows H:2H  = W2^T     (cols 0:H)
                           rows 2H:3H = Wc1^T    (cols 0:H)
                           row  3H    = Wc2^T    (cols 0:H)
    wcol_ref: [H, 8]       col 0 = W1 radial column, col 1 = b1, col 2 = b2,
                           col 3 = bc1
    out_ref : [8+H, TE]    row 0 = radial, rows 1:4 = trans, rows 8:8+H = ef
    """
    # coord_diff = x_src - x_dst ; radial = sum(coord_diff**2)
    cd = edge_ref[0:3, :] - edge_ref[4:7, :]                     # [3, TE]
    radial = jnp.sum(cd * cd, axis=0, keepdims=True)             # [1, TE]

    hh = edge_ref[8:8 + 2 * F, :]                                # [2F, TE]

    # static (free) slices of the packed weight operands
    w1hh_t = wmat_ref[0:H, 0:2 * F]                              # [H, 2F]
    w2_t = wmat_ref[H:2 * H, 0:H]                                # [H, H]
    wc1_t = wmat_ref[2 * H:3 * H, 0:H]                           # [H, H]
    wc2_r = wmat_ref[3 * H:3 * H + 1, 0:H]                       # [1, H]

    w1r = wcol_ref[:, 0:1]                                       # [H, 1]
    b1 = wcol_ref[:, 1:2]
    b2 = wcol_ref[:, 2:3]
    bc1 = wcol_ref[:, 3:4]

    # edge_mlp layer 1 on cat([radial, hh_src, hh_dst]) — the concat is folded
    # into (broadcast mul for the radial column) + (one matmul for both hh's).
    h1 = _silu(w1r * radial
               + jnp.dot(w1hh_t, hh, preferred_element_type=jnp.float32)
               + b1)                                             # [H, TE]
    ef = _silu(jnp.dot(w2_t, h1, preferred_element_type=jnp.float32) + b2)

    # coord_mlp: Linear(H,H) -> SiLU -> Linear(H,1,no bias) -> (Tanh)
    c1 = _silu(jnp.dot(wc1_t, ef, preferred_element_type=jnp.float32) + bc1)
    scale = jnp.dot(wc2_r, c1, preferred_element_type=jnp.float32)  # [1, TE]
    if tanh:
        scale = jnp.tanh(scale)

    if normalize:
        # exact (approx=False) keeps bit-level agreement with the division in
        # the PyTorch reference; only a [1, TE] row so cost is negligible.
        cd = cd * pl.reciprocal(jnp.sqrt(radial) + EPS, approx=False)

    out_ref[0:1, :] = radial
    out_ref[1:4, :] = cd * scale
    out_ref[8:8 + H, :] = ef                 # sublane-aligned, unmasked store


def relative_position_cord_message(x_src, x_dst, hh_src, hh_dst, params,
                                    *, normalize=True, tanh=True, tile_e=None):
    E, F = hh_src.shape
    H = params["w2"].shape[0]
    W = max(H, 2 * F)
    f32 = jnp.float32

    # ---- tile choice: big lane tiles, no divisibility requirement on E,
    #      keep >=2 grid steps when possible (megacore) ----------------------
    e_blk = _round_up(E, 128)
    if tile_e is None:
        tile_e = min(2048, e_blk)
        if e_blk > 128 and e_blk // tile_e < 2:
            tile_e = _round_up(max(128, e_blk // 2), 128)
    else:
        tile_e = _round_up(tile_e, 128)
    grid_e = -(-e_blk // tile_e)          # cdiv
    e_pad = grid_e * tile_e               # padded edges (zeros -> finite math)

    # ---- pack all per-edge inputs into ONE operand (edges on lanes) --------
    edge_in = jnp.zeros((8 + 2 * F, e_pad), f32)
    edge_in = edge_in.at[0:3, :E].set(x_src.T.astype(f32))
    edge_in = edge_in.at[4:7, :E].set(x_dst.T.astype(f32))
    edge_in = edge_in.at[8:8 + F, :E].set(hh_src.T.astype(f32))
    edge_in = edge_in.at[8 + F:8 + 2 * F, :E].set(hh_dst.T.astype(f32))

    # ---- pack weights into 2 small operands (static .at[] slices are free) -
    w1 = params["w1"]                                     # [1+2F, H]
    wmat = jnp.zeros((3 * H + 8, W), f32)
    wmat = wmat.at[0:H, 0:2 * F].set(w1[1:1 + 2 * F, :].T)
    wmat = wmat.at[H:2 * H, 0:H].set(params["w2"].T)
    wmat = wmat.at[2 * H:3 * H, 0:H].set(params["wc1"].T)
    wmat = wmat.at[3 * H, 0:H].set(params["wc2"][:, 0])

    wcol = jnp.zeros((H, 8), f32)
    wcol = wcol.at[:, 0].set(w1[0, :])
    wcol = wcol.at[:, 1].set(params["b1"])
    wcol = wcol.at[:, 2].set(params["b2"])
    wcol = wcol.at[:, 3].set(params["bc1"])

    kernel = functools.partial(egnn_edge_kernel, F=F, H=H,
                               normalize=normalize, tanh=tanh)

    out = pl.pallas_call(
        kernel,
        out_shape=jax.ShapeDtypeStruct((8 + H, e_pad), f32),
        grid_spec=pltpu.PrefetchScalarGridSpec(
            num_scalar_prefetch=0,
            grid=(grid_e,),
            in_specs=[
                pl.BlockSpec((8 + 2 * F, tile_e), lambda i: (0, i)),
                pl.BlockSpec((3 * H + 8, W), lambda i: (0, 0)),
                pl.BlockSpec((H, 8), lambda i: (0, 0)),
            ],
            out_specs=pl.BlockSpec((8 + H, tile_e), lambda i: (0, i)),
        ),
        compiler_params=pltpu.CompilerParams(
            dimension_semantics=("parallel",),
            vmem_limit_bytes=32 * 1024 * 1024,
        ),
    )(edge_in, wmat, wcol)

    # TODO(synk): if downstream tolerates bf16, cast hh inputs / ef output to
    # bfloat16 at the HBM boundary on v6e/v7x to halve the dominant traffic.
    radial = out[0:1, :E].T            # [E, 1]
    trans = out[1:4, :E].T             # [E, 3]
    edge_feature = out[8:8 + H, :E].T  # [E, H]
    return radial, trans, edge_feature


def _reference(x_src, x_dst, hh_src, hh_dst, params, *, normalize=True, tanh=True):
    """Pure-JAX mirror of the PyTorch forward (for correctness check)."""
    cd0 = x_src - x_dst
    cd = x_src - x_dst
    radial = jnp.sum(cd0 ** 2, axis=1, keepdims=True)
    ef_in = jnp.concatenate([radial, hh_src, hh_dst], axis=1)
    h = _silu(ef_in @ params["w1"] + params["b1"])
    ef = _silu(h @ params["w2"] + params["b2"])
    if normalize:
        cd = cd / (jnp.sqrt(radial) + EPS)
    c = _silu(ef @ params["wc1"] + params["bc1"]) @ params["wc2"]
    if tanh:
        c = jnp.tanh(c)
    return radial, cd * c, ef


if __name__ == "__main__":
    E, F, H = 256, 8, 32   # edges, input_nf, hidden_nf
    key = jax.random.PRNGKey(0)
    ks = jax.random.split(key, 12)

    x_src = jax.random.normal(ks[0], (E, 3), jnp.float32)
    x_dst = jax.random.normal(ks[1], (E, 3), jnp.float32)
    hh_src = jax.random.normal(ks[2], (E, F), jnp.float32)
    hh_dst = jax.random.normal(ks[3], (E, F), jnp.float32)

    # Deterministic synthetic parameters (shapes per module __init__),
    # stored [in, out] so forward is x @ W + b.
    params = {
        "w1": 0.1 * jax.random.normal(ks[4], (1 + 2 * F, H), jnp.float32),
        "b1": 0.1 * jax.random.normal(ks[5], (H,), jnp.float32),
        "w2": 0.1 * jax.random.normal(ks[6], (H, H), jnp.float32),
        "b2": 0.1 * jax.random.normal(ks[7], (H,), jnp.float32),
        "wc1": 0.1 * jax.random.normal(ks[8], (H, H), jnp.float32),
        "bc1": 0.1 * jax.random.normal(ks[9], (H,), jnp.float32),
        # xavier_uniform_(gain=0.001): tiny values, no bias.
        "wc2": 0.001 * jax.random.uniform(ks[10], (H, 1), jnp.float32,
                                          minval=-1.0, maxval=1.0),
    }

    outs = relative_position_cord_message(
        x_src, x_dst, hh_src, hh_dst, params, normalize=True, tanh=True)
    jax.block_until_ready(outs)

    ref = _reference(x_src, x_dst, hh_src, hh_dst, params,
                     normalize=True, tanh=True)
    names = ("radial", "trans", "edge_feature")
    for name, got, exp in zip(names, outs, ref):
        assert got.shape == exp.shape, f"{name}: shape {got.shape} vs {exp.shape}"
        assert jnp.allclose(got, exp, rtol=1e-4, atol=1e-5), f"mismatch: {name}"

    print("KERNEL_OK")
</pallas_src>

<mosaic_0001>
module attributes {stable_mosaic.version = 11 : i64} {
  func.func @egnn_edge_kernel(%arg0: i32, %arg1: memref<24x128xf32, #tpu.memory_space<vmem>>, %arg2: memref<104x32xf32, #tpu.memory_space<vmem>>, %arg3: memref<32x8xf32, #tpu.memory_space<vmem>>, %arg4: memref<40x128xf32, #tpu.memory_space<vmem>>) attributes {dimension_semantics = [#tpu.dimension_semantics<parallel>], iteration_bounds = array<i64: 2>, scalar_prefetch = 0 : i64, scratch_operands = 0 : i64, tpu.core_type = #tpu.core_type<tc>, window_params = [{transform_indices = @transform_0, window_bounds = array<i64: 24, 128>}, {pipeline_mode = #tpu.pipeline_mode<synchronous>, transform_indices = @transform_1, window_bounds = array<i64: 104, 32>}, {pipeline_mode = #tpu.pipeline_mode<synchronous>, transform_indices = @transform_2, window_bounds = array<i64: 32, 8>}, {transform_indices = @transform_3, window_bounds = array<i64: 40, 128>}]} {
    %c0 = arith.constant 0 : index
    %c0_0 = arith.constant 0 : index
    %0 = vector.load %arg1[%c0, %c0_0] : memref<24x128xf32, #tpu.memory_space<vmem>>, vector<3x128xf32>
    %c4 = arith.constant 4 : index
    %c0_1 = arith.constant 0 : index
    %1 = vector.load %arg1[%c4, %c0_1] : memref<24x128xf32, #tpu.memory_space<vmem>>, vector<3x128xf32>
    %2 = arith.subf %0, %1 : vector<3x128xf32>
    %3 = arith.mulf %2, %2 : vector<3x128xf32>
    %cst = arith.constant dense<0.000000e+00> : vector<128xf32>
    %4 = vector.multi_reduction <add>, %3, %cst [0] : vector<3x128xf32> to vector<128xf32>
    %5 = vector.shape_cast %4 : vector<128xf32> to vector<1x128xf32>
    %c8 = arith.constant 8 : index
    %c0_2 = arith.constant 0 : index
    %6 = vector.load %arg1[%c8, %c0_2] : memref<24x128xf32, #tpu.memory_space<vmem>>, vector<16x128xf32>
    %c0_3 = arith.constant 0 : index
    %c0_4 = arith.constant 0 : index
    %7 = vector.load %arg2[%c0_3, %c0_4] : memref<104x32xf32, #tpu.memory_space<vmem>>, vector<32x16xf32>
    %c32 = arith.constant 32 : index
    %c0_5 = arith.constant 0 : index
    %8 = vector.load %arg2[%c32, %c0_5] : memref<104x32xf32, #tpu.memory_space<vmem>>, vector<32x32xf32>
    %c64 = arith.constant 64 : index
    %c0_6 = arith.constant 0 : index
    %9 = vector.load %arg2[%c64, %c0_6] : memref<104x32xf32, #tpu.memory_space<vmem>>, vector<32x32xf32>
    %c96 = arith.constant 96 : index
    %c0_7 = arith.constant 0 : index
    %10 = vector.load %arg2[%c96, %c0_7] : memref<104x32xf32, #tpu.memory_space<vmem>>, vector<1x32xf32>
    %c0_8 = arith.constant 0 : index
    %c0_9 = arith.constant 0 : index
    %11 = vector.load %arg3[%c0_8, %c0_9] : memref<32x8xf32, #tpu.memory_space<vmem>>, vector<32x1xf32>
    %c0_10 = arith.constant 0 : index
    %c1 = arith.constant 1 : index
    %12 = vector.load %arg3[%c0_10, %c1] : memref<32x8xf32, #tpu.memory_space<vmem>>, vector<32x1xf32>
    %c0_11 = arith.constant 0 : index
    %c2 = arith.constant 2 : index
    %13 = vector.load %arg3[%c0_11, %c2] : memref<32x8xf32, #tpu.memory_space<vmem>>, vector<32x1xf32>
    %c0_12 = arith.constant 0 : index
    %c3 = arith.constant 3 : index
    %14 = vector.load %arg3[%c0_12, %c3] : memref<32x8xf32, #tpu.memory_space<vmem>>, vector<32x1xf32>
    %15 = vector.broadcast %11 : vector<32x1xf32> to vector<32x128xf32>
    %16 = vector.broadcast %5 : vector<1x128xf32> to vector<32x128xf32>
    %17 = arith.mulf %15, %16 : vector<32x128xf32>
    %cst_13 = arith.constant dense<0.000000e+00> : vector<32x128xf32>
    %18 = tpu.matmul %7, %6, %cst_13 {dimension_numbers = #tpu.dot_dimension_numbers<[1], [0], [0], [1], [0, 0, 1, 1], [], []>} : vector<32x16xf32>, vector<16x128xf32>, vector<32x128xf32> -> vector<32x128xf32>
    %19 = arith.addf %17, %18 : vector<32x128xf32>
    %20 = vector.broadcast %12 : vector<32x1xf32> to vector<32x128xf32>
    %21 = arith.addf %19, %20 : vector<32x128xf32>
    %22 = arith.negf %21 : vector<32x128xf32>
    %23 = math.exp %22 : vector<32x128xf32>
    %cst_14 = arith.constant 1.000000e+00 : f32
    %24 = vector.broadcast %cst_14 : f32 to vector<32x128xf32>
    %25 = arith.addf %24, %23 : vector<32x128xf32>
    %26 = arith.divf %24, %25 : vector<32x128xf32>
    %27 = arith.mulf %21, %26 : vector<32x128xf32>
    %cst_15 = arith.constant dense<0.000000e+00> : vector<32x128xf32>
    %28 = tpu.matmul %8, %27, %cst_15 {dimension_numbers = #tpu.dot_dimension_numbers<[1], [0], [0], [1], [0, 0, 1, 1], [], []>} : vector<32x32xf32>, vector<32x128xf32>, vector<32x128xf32> -> vector<32x128xf32>
    %29 = vector.broadcast %13 : vector<32x1xf32> to vector<32x128xf32>
    %30 = arith.addf %28, %29 : vector<32x128xf32>
    %31 = arith.negf %30 : vector<32x128xf32>
    %32 = math.exp %31 : vector<32x128xf32>
    %cst_16 = arith.constant 1.000000e+00 : f32
    %33 = vector.broadcast %cst_16 : f32 to vector<32x128xf32>
    %34 = arith.addf %33, %32 : vector<32x128xf32>
    %35 = arith.divf %33, %34 : vector<32x128xf32>
    %36 = arith.mulf %30, %35 : vector<32x128xf32>
    %cst_17 = arith.constant dense<0.000000e+00> : vector<32x128xf32>
    %37 = tpu.matmul %9, %36, %cst_17 {dimension_numbers = #tpu.dot_dimension_numbers<[1], [0], [0], [1], [0, 0, 1, 1], [], []>} : vector<32x32xf32>, vector<32x128xf32>, vector<32x128xf32> -> vector<32x128xf32>
    %38 = vector.broadcast %14 : vector<32x1xf32> to vector<32x128xf32>
    %39 = arith.addf %37, %38 : vector<32x128xf32>
    %40 = arith.negf %39 : vector<32x128xf32>
    %41 = math.exp %40 : vector<32x128xf32>
    %cst_18 = arith.constant 1.000000e+00 : f32
    %42 = vector.broadcast %cst_18 : f32 to vector<32x128xf32>
    %43 = arith.addf %42, %41 : vector<32x128xf32>
    %44 = arith.divf %42, %43 : vector<32x128xf32>
    %45 = arith.mulf %39, %44 : vector<32x128xf32>
    %cst_19 = arith.constant dense<0.000000e+00> : vector<1x128xf32>
    %46 = tpu.matmul %10, %45, %cst_19 {dimension_numbers = #tpu.dot_dimension_numbers<[1], [0], [0], [1], [0, 0, 1, 1], [], []>} : vector<1x32xf32>, vector<32x128xf32>, vector<1x128xf32> -> vector<1x128xf32>
    %47 = math.tanh %46 : vector<1x128xf32>
    %48 = math.sqrt %5 : vector<1x128xf32>
    %cst_20 = arith.constant 9.99999993E-9 : f32
    %49 = vector.broadcast %cst_20 : f32 to vector<1x128xf32>
    %50 = arith.addf %48, %49 : vector<1x128xf32>
    %51 = tpu.reciprocal %50 : vector<1x128xf32> -> vector<1x128xf32>
    %52 = vector.broadcast %51 : vector<1x128xf32> to vector<3x128xf32>
    %53 = arith.mulf %2, %52 : vector<3x128xf32>
    %c0_21 = arith.constant 0 : index
    %c0_22 = arith.constant 0 : index
    %54 = vector.load %arg4[%c0_21, %c0_22] : memref<40x128xf32, #tpu.memory_space<vmem>>, vector<1x128xf32>
    tpu.vector_store %arg4[%c0_21, %c0_22], %5 {strides = array<i32>} : memref<40x128xf32, #tpu.memory_space<vmem>>, vector<1x128xf32>,
    %55 = vector.broadcast %47 : vector<1x128xf32> to vector<3x128xf32>
    %56 = arith.mulf %53, %55 : vector<3x128xf32>
    %c1_23 = arith.constant 1 : index
    %c0_24 = arith.constant 0 : index
    %57 = vector.load %arg4[%c1_23, %c0_24] : memref<40x128xf32, #tpu.memory_space<vmem>>, vector<3x128xf32>
    tpu.vector_store %arg4[%c1_23, %c0_24], %56 {strides = array<i32>} : memref<40x128xf32, #tpu.memory_space<vmem>>, vector<3x128xf32>,
    %c8_25 = arith.constant 8 : index
    %c0_26 = arith.constant 0 : index
    %58 = vector.load %arg4[%c8_25, %c0_26] : memref<40x128xf32, #tpu.memory_space<vmem>>, vector<32x128xf32>
    tpu.vector_store %arg4[%c8_25, %c0_26], %36 {strides = array<i32>} : memref<40x128xf32, #tpu.memory_space<vmem>>, vector<32x128xf32>,
    return
  }
  func.func @transform_0(%arg0: i32) -> (i32, i32) {
    %c0_i32 = arith.constant 0 : i32
    %c0_i32_0 = arith.constant 0 : i32
    return %c0_i32, %arg0 : i32, i32
  }
  func.func @transform_1(%arg0: i32) -> (i32, i32) {
    %c0_i32 = arith.constant 0 : i32
    %c0_i32_0 = arith.constant 0 : i32
    %c0_i32_1 = arith.constant 0 : i32
    return %c0_i32, %c0_i32_0 : i32, i32
  }
  func.func @transform_2(%arg0: i32) -> (i32, i32) {
    %c0_i32 = arith.constant 0 : i32
    %c0_i32_0 = arith.constant 0 : i32
    %c0_i32_1 = arith.constant 0 : i32
    return %c0_i32, %c0_i32_0 : i32, i32
  }
  func.func @transform_3(%arg0: i32) -> (i32, i32) {
    %c0_i32 = arith.constant 0 : i32
    %c0_i32_0 = arith.constant 0 : i32
    return %c0_i32, %arg0 : i32, i32
  }
}

</mosaic_0001>

<bundles_post_ra>
// kernel: tpu_custom_call.1
= control target key start
LH: loop header
LB: loop body
LE: loop exit
PB: predicated region body
PF: predicated region fallthrough
CT: control target
= control target key end

     0   :  { %8 = vsyncpa [#allocation4], 0  ;;  %s1446_s0 = inlined_call_operand.vmem [shape: f32[24,256], index: 0, kind: input, shape index: {}]   ;;  %s1447_s1 = inlined_call_operand.vmem [shape: f32[104,32], index: 1, kind: input, shape index: {}]   ;;  %s1448_s2 = inlined_call_operand.vmem [shape: f32[32,8], index: 2, kind: input, shape index: {}]   ;;  %s1449_s3 = inlined_call_operand.hbm [shape: f32[40,256], index: 3, kind: output, shape index: {}]  }
   0x1   :  { %10 = vsyncpa [#allocation4 + $0x1], 0  ;;  %s1219_s12 = smov 0   ;;  %s1221_s13 = smov 0  }
   0x2   :  { %s1223_s14 = smov 0   ;;  %s1225_s15 = smov 0  }
   0x3 LB: > { %s874_s16 = sadd.s32 4294967295, %s1186_s15   ;;  %s875_s17 = sadd.s32 4294967294, %s1186_s15   ;;  %s1186_s15 = sphi %s1225_s15, %s1455_s15   ;;  %s1182_s14 = sphi %s1223_s14, %s1454_s14   ;;  %s1178_s13 = sphi %s1221_s13, %s1453_s13   ;;  %s1174_s12 = sphi %s1219_s12, %s1452_s12  }
   0x4   : > { %s1242_s18 = sadd.s32 1, %s1186_s15   ;;  %s23_s19 = sadd.s32 1, %s1182_s14 }
   0x5   : > { %s20_s20 = ssub.s32 %s1186_s15, %s1242_s18  ;;  %p30_p0 = scmp.ne.s32.totalorder %s1182_s14, %s1178_s13 }
   0x6   : > { %p21_p1 = scmp.eq.s32.totalorder %s20_s20, 0  ;;  %p31_p2 = scmp.eq.s32.totalorder %s1186_s15, 0 }
   0x7   : > { %p102_p3 = scmp.eq.s32.totalorder %s874_s16, 1  ;;  %p107_p4 = scmp.ne.s32.totalorder %s1178_s13, %s1174_s12 }
   0x8   : > { %s1255_s21 = scalar_select %p21_p1, %s1182_s14, %s23_s19  }
   0x9   : > { %p32_p5 = por %p31_p2, %p30_p0  ;;  %p1257_p6 = por %p102_p3, %p30_p0 }
   0xa   : > { %p108_p7 = scmp.eq.s32.totalorder %s875_s17, 1  ;;  %p877_p9 = scmp.ge.s32.totalorder %s1186_s15, 2 }
   0xc   : > { %p1261_p8 = por %p108_p7, %p107_p4  ;;  %130 = sbr.rel (%p877_p9) target bundleno = 26 (0x1a), region = 24 }
  0x13   : > { %133 = sbr.rel (!%p32_p5) target bundleno = 26 (0x1a), region = 28  ;;  %s135_s24 = sand.u32 (%p32_p5), 1, %s1182_s14  }
  0x14   : > { %s878_s25 = sshll.u32 (%p32_p5), %s1186_s15, 3  ;;  %s1010_s26 = smul.u32 (%p32_p5), 24, %s135_s24 }
  0x15   : > { %s139_s29 = scalar_lea.vmem (%p32_p5), %s1446_s0, %s878_s25 }
  0x16   : > { %v171_v0 = vld [vmem:[%s139_s29] sm:$0xff] (%p32_p5)  ;;  %v173_v1 = vld [vmem:[%s139_s29 + $0x10] sm:$0xff] (%p32_p5)  ;;  %s137_s30 = scalar_lea.vmem (%p32_p5), [#allocation2], %s1010_s26 }
  0x17   : > { %v175_v2 = vld [vmem:[%s139_s29 + $0x20] sm:$0xff] (%p32_p5)  ;;  %172 = vst [vmem:[%s137_s30] sm:$0xff] (%p32_p5), %v171_v0  ;;  %174 = vst [vmem:[%s137_s30 + $0x8] sm:$0xff] (%p32_p5), %v173_v1 }
  0x18   : > { %176 = vst [vmem:[%s137_s30 + $0x10] sm:$0xff] (%p32_p5), %v175_v2 }
  0x1a PF: > { %p879_p10 = scmp.ge.s32.totalorder %s1186_s15, 1  ;;  %p181_p11 = scmp.lt.s32.totalorder %s1186_s15, 3 }
  0x1c   : > { %p182_p12 = pnand %p879_p10, %p181_p11 }
  0x1d   : > { %s1276_s4 = sand.u32 (!%p182_p12), 1, %s1178_s13   ;;  %v225_v3 = vld [vmem:[%s1447_s1] sm:$0xff] (!%p182_p12)  ;;  %vm266_vm0 = vcmask (!%p182_p12), 130048   ;;  %v1286_v4 = vld [vmem:[%s1448_s2 + $0x10] sm:$0xff] (!%p182_p12)  ;;  %v1188_v6 = vmov (!%p182_p12), 0   ;;  %v1298_v7 = vld [vmem:[%s1448_s2 + $0x18] sm:$0xff] (!%p182_p12) }
  0x1e   : > { %185 = sbr.rel (%p182_p12) target bundleno = 1045 (0x415), region = 66  ;;  %939 = vmatprep.mubr.msk.f32.mxu0 (!%p182_p12), %vm266_vm0, %v225_v3  ;;  %v1291_v5 = vld [vmem:[%s1448_s2] sm:$0xff] (!%p182_p12)  ;;  %1063 = vset.pattern.permute.xlu1 (!%p182_p12), %v1188_v6  ;;  %v1303_v8 = vld [vmem:[%s1448_s2 + $0x8] sm:$0xff] (!%p182_p12)  ;;  %vm215_vm1 = vcmask (!%p182_p12), 1042432   ;;  %v227_v19 = vld [vmem:[%s1447_s1 + $0x10] sm:$0xff] (!%p182_p12)  ;;  %v1189_v20 = vmov (!%p182_p12), 1  }
  0x1f   : > { %s1011_s7 = smul.u32 (!%p182_p12), 24, %s1276_s4  ;;  %1062 = vset.pattern.permute.xlu0 (!%p182_p12), %v1188_v6  ;;  %254 = vperm.xlu1 (!%p182_p12), %1063, %v1286_v4   ;;  %v226_v17 = vld [vmem:[%s1447_s1 + $0x8] sm:$0xff] (!%p182_p12)  ;;  %v228_v22 = vld [vmem:[%s1447_s1 + $0x18] sm:$0xff] (!%p182_p12)  ;;  %v229_v27 = vld [vmem:[%s1447_s1 + $0x20] sm:$0xff] (!%p182_p12)  ;;  %vm432_vm2 = vcmask (!%p182_p12), 261120   ;;  %v1190_v28 = vmov (!%p182_p12), 2  }
  0x20   : > { %244 = vperm.xlu0 (!%p182_p12), %1062, %v1291_v5   ;;  %s1012_s6 = smul.u32 (!%p182_p12), 40, %s1276_s4  ;;  %953 = vmatprep.mubr.msk.f32.mxu1 (!%p182_p12), %vm432_vm2, %v229_v27  ;;  %vm1193_vm3 = vmmov (!%p182_p12), 0   ;;  %s905_s11 = sshll.u32 (!%p182_p12), %s874_s16, 7 }
  0x21   : > { %s190_s25 = scalar_lea.vmem (!%p182_p12), [#allocation2], %s1011_s7  ;;  %s1401_s20 = scalar_lea.hbm (!%p182_p12), %s1449_s3, %s905_s11 }
  0x22   : > { %v211_v9 = vld [vmem:[%s190_s25] sm:$0x7] (!%p182_p12)  ;;  %v212_v10 = vld [vmem:[%s190_s25 + $0x4] sm:$0x7] (!%p182_p12)  ;;  %v223_v11 = vld [vmem:[%s190_s25 + $0x8] sm:$0xff] (!%p182_p12)  ;;  %s1330_s7 = scalar_lea.vmem (!%p182_p12), [#allocation3], %s1012_s6 }
  0x23   : > { %v1305_v12 = vsub.f32 (!%p182_p12), %v211_v9, %v212_v10  ;;  %v224_v13 = vld [vmem:[%s190_s25 + $0x10] sm:$0xff] (!%p182_p12)  ;;  %259 = vperm.xlu1 (!%p182_p12), %1063, %v1298_v7   ;;  %s807_s10 = sshll.u32 (!%p182_p12), %s1330_s7, 4  ;;  %s795_s24 = scalar_lea.sflag (!%p182_p12), [#allocation4], %s1276_s4  ;;  %s1396_s10 = int_to_ptr.vmem [resolvable:$true] %s807_s10 }
  0x24   : > { %v984_v14 = vpack.c.bf16 (!%p182_p12), %v224_v13, %v223_v11  ;;  %249 = vperm.xlu0 (!%p182_p12), %1062, %v1303_v8   ;;  %s1124_s25 = scalar_lea.vmem (!%p182_p12), %s1396_s10, 640  ;;  %s1195_s16 = smov (!%p182_p12), [#allocation3]  }
  0x25   : > { %v214_v15 = vmul.f32 %v1305_v12, %v1305_v12  ;;  %p1125_p13 = scmp.ne.s32.totalorder %s1396_s10, %s1124_s25  ;;  %s1128_s26 = sshll.u32 %s1195_s16, 4  ;;  %s1129_s26 = int_to_ptr.vmem [resolvable:$false] %s1128_s26 }
  0x26   : > { %985 = vmatprep.subr.bf16.mxu0 %v984_v14  ;;  %s1130_s27 = scalar_lea.vmem %s1129_s26, 1280  ;;  %p1131_p2 = scmp.lt.s32.totalorder %s1396_s10, %s1129_s26 }
  0x27   : > { %v216_v16 = vsel %vm215_vm1, %v214_v15, 0.0  ;;  %987 = vmatpush3.bf16.msra.mxu0 %v984_v14  ;;  %1065 = vset.pattern.permute.xlu1 %v1189_v20  ;;  %p1126_p0 = pnand %p1125_p13, %p1257_p6  ;;  %p1132_p3 = scmp.lt.s32.totalorder %s1130_s27, %s1124_s25 }
  0x28   : > { %v217_v18 = vrot.slane %v216_v16, 4  ;;  %1064 = vset.pattern.permute.xlu0 %v1189_v20  ;;  %373 = vperm.xlu1 %1065, %v1303_v8   ;;  %v1191_v20 = vmov 3  }
  0x29   : > { %369 = vperm.xlu0 %1064, %v1291_v5   ;;  %p1127_p1 = pneg %p1126_p0  ;;  %p1133_p4 = por %p1132_p3, %p1131_p2 }
  0x2a   : > { %v218_v21 = vadd.f32 %v217_v18, %v216_v16  ;;  %940 = vmatmul.mubr.msk.f32.vlgmr.msra.gmra.mrb[0].mxu0 %vm266_vm0, %v226_v17  ;;  %v230_v16 = vld [vmem:[%s1447_s1 + $0x28] sm:$0xff]  ;;  %v231_v17 = vld [vmem:[%s1447_s1 + $0x30] sm:$0xff]  ;;  %v232_v18 = vld [vmem:[%s1447_s1 + $0x38] sm:$0xff] }
  0x2b   : > { %942 = vmatprep.mubr.msk.f32.mxu0 %vm266_vm0, %v227_v19  ;;  %v233_v19 = vld [vmem:[%s1447_s1 + $0x40] sm:$0xff]  ;;  %p1134_p5 = pnand %p1133_p4, %p1127_p1 }
  0x2c   : > { %v219_v23 = vrot.slane %v218_v21, 2  ;;  %377 = vperm.xlu1 %1065, %v1286_v4  }
  0x2d   : > { %381 = vperm.xlu0 %1064, %v1298_v7  }
  0x2e   : > { %v220_v24 = vadd.f32 %v219_v23, %v218_v21  ;;  %943 = vmatmul.mubr.msk.f32.gmra.mrb[2].mxu0 %vm266_vm0, %v228_v22 }
  0x2f   : > { %967 = vmatprep.mubr.msk.f32.mxu0 %vm432_vm2, %v233_v19 }
  0x30   : > { %v221_v25 = vrot.slane %v220_v24, 1  ;;  %1066 = vset.pattern.permute.xlu1 %v1190_v28 }
  0x31   : > { %1067 = vset.pattern.permute.xlu0 %v1190_v28  ;;  %417 = vperm.xlu1 %1066, %v1291_v5  }
  0x32   : > { %v1328_v26 = vadd.f32 %v221_v25, %v220_v24  ;;  %421 = vperm.xlu0 %1067, %v1303_v8  }
  0x34   : > { %783 = vst [vmem:[%s1330_s7] sm:$0x1] %v1328_v26  ;;  %vm775_vm4 = vcmp.eq.f32.partialorder %v1328_v26, inf  ;;  %vm777_vm5 = vcmp.eq.f32.partialorder %v1328_v26, 0.0 }
  0x35   : > { %425 = vperm.xlu1 %1066, %v1286_v4  }
  0x36   : > { %1068 = vset.pattern.permute.xlu0 %v1191_v20 }
  0x37   : > { %559 = vperm.xlu0 %1068, %v1291_v5  }
  0x39   : > { %429 = vperm.xlu1 %1066, %v1298_v7  }
  0x3b   : > { %571 = vperm.xlu0 %1068, %v1298_v7  }
  0x3d   : > { %1069 = vset.pattern.permute.xlu1 %v1191_v20 }
  0x3e   : > { %563 = vperm.xlu1 %1069, %v1303_v8  }
  0x42   : > { %567 = vperm.xlu1 %1069, %v1286_v4  }
  0x9e   : > { %v255_v30 = vpop.permute.xlu1 %254 }
  0x9f   : > { %v245_v29 = vpop.permute.xlu0 %244  ;;  %v264_v43 = vmul.f32 %v255_v30, %v1328_v26 }
  0xa0   : > { %v262_v34 = vmul.f32 %v245_v29, %v1328_v26 }
  0xa2   : > { %v260_v32 = vpop.permute.xlu1 %259 }
  0xa3   : > { %v250_v31 = vpop.permute.xlu0 %249  ;;  %v265_v41 = vmul.f32 %v260_v32, %v1328_v26 }
  0xa4   : > { %v263_v33 = vmul.f32 %v250_v31, %v1328_v26 }
  0xa7   : > { %v374_v37 = vpop.permute.xlu1 %373 }
  0xa8   : > { %v370_v35 = vpop.permute.xlu0 %369 }
  0xab   : > { %v378_v52 = vpop.permute.xlu1 %377 }
  0xac   : > { %v382_v50 = vpop.permute.xlu0 %381 }
  0xb0   : > { %v418_v21 = vpop.permute.xlu1 %417 }
  0xb1   : > { %v422_v23 = vpop.permute.xlu0 %421 }
  0xb4   : > { %v426_v22 = vpop.permute.xlu1 %425 }
  0xb8   : > { %v430_v30 = vpop.permute.xlu1 %429 }
  0xfd   : > { %v941_v36 = vpop.f32.mrb[0].mxu0 }
  0xfe   : > { %v365_v38 = vadd.f32 %v941_v36, %v263_v33  ;;  %v345_v39 = vpop.f32.mrb[1].mxu0 }
  0xff   : > { %v364_v40 = vadd.f32 %v345_v39, %v262_v34 }
 0x100   : > { %v385_v42 = vadd.f32 %v374_v37, %v365_v38 }
 0x101   : > { %v384_v44 = vadd.f32 %v370_v35, %v364_v40  ;;  %v944_v45 = vpop.f32.mrb[2].mxu0 }
 0x102   : > { %v885_v46 = vmul.f32 -1.442695, %v385_v42  ;;  %v367_v47 = vadd.f32 %v944_v45, %v265_v41  ;;  %v355_v48 = vpop.f32.mrb[3].mxu0 }
 0x103   : > { %v884_v49 = vmul.f32 -1.442695, %v384_v44  ;;  %v366_v51 = vadd.f32 %v355_v48, %v264_v43 }
 0x104   : > { %1070 = vpow2.f32 %v885_v46  ;;  %v387_v53 = vadd.f32 %v382_v50, %v367_v47 }
 0x105   : > { %1072 = vpow2.f32 %v884_v49  ;;  %v386_v54 = vadd.f32 %v378_v52, %v366_v51  ;;  %v234_v52 = vld [vmem:[%s1447_s1 + $0x48] sm:$0xff] }
 0x106   : > { %v887_v55 = vmul.f32 -1.442695, %v387_v53 }
 0x107   : > { %v886_v56 = vmul.f32 -1.442695, %v386_v54 }
 0x108   : > { %1074 = vpow2.f32 %v887_v55  ;;  %v1192_v55 = vmov 0.0|0.0  }
 0x109   : > { %1076 = vpow2.f32 %v886_v56  ;;  %v1194_v56 = vmov 0.0  }
 0x10e   : > { %v1071_v57 = vpop.eup %1070 }
 0x10f   : > { %v1073_v58 = vpop.eup %1072  ;;  %v401_v59 = vadd.f32 1.0, %v1071_v57  ;;  %v560_v57 = vpop.permute.xlu0 %559 }
 0x110   : > { %v400_v60 = vadd.f32 1.0, %v1073_v58  ;;  %v564_v58 = vpop.permute.xlu1 %563 }
 0x111   : > { %1078 = vrcp.f32 %v401_v59 }
 0x112   : > { %v1075_v61 = vpop.eup %1074  ;;  %1080 = vrcp.f32 %v400_v60 }
 0x113   : > { %v1077_v62 = vpop.eup %1076  ;;  %v403_v63 = vadd.f32 1.0, %v1075_v61 }
 0x114   : > { %v402_v0 = vadd.f32 1.0, %v1077_v62 }
 0x115   : > { %1082 = vrcp.f32 %v403_v63 }
 0x116   : > { %1084 = vrcp.f32 %v402_v0  ;;  %v572_v0 = vpop.permute.xlu0 %571 }
 0x11b   : > { %v1079_v1 = vpop.eup %1078 }
 0x11c   : > { %v1081_v2 = vpop.eup %1080  ;;  %v413_v3 = vmul.f32 %v1079_v1, %v385_v42 }
 0x11d   : > { %v412_v6 = vmul.f32 %v1081_v2, %v384_v44 }
 0x11f   : > { %v1083_v9 = vpop.eup %1082  ;;  %v988_v10 = vpack.c.bf16 %v413_v3, %v412_v6  ;;  %v568_v3 = vpop.permute.xlu1 %567 }
 0x120   : > { %v1085_v11 = vpop.eup %1084  ;;  %v415_v13 = vmul.f32 %v1083_v9, %v387_v53  ;;  %v235_v53 = vld [vmem:[%s1447_s1 + $0x50] sm:$0xff] }
 0x121   : > { %v414_v14 = vmul.f32 %v1085_v11, %v386_v54  ;;  %989 = vmatprep.subr.bf16.mxu1 %v988_v10  ;;  %v236_v54 = vld [vmem:[%s1447_s1 + $0x58] sm:$0xff] }
 0x122   : > { %991 = vmatpush3.bf16.msra.mxu1 %v988_v10 }
 0x123   : > { %v992_v15 = vpack.c.bf16 %v415_v13, %v414_v14 }
 0x125   : > { %993 = vmatprep.subr.bf16.mxu1 %v992_v15 }
 0x126   : > { %995 = vmatpush3.bf16.msra.mxu1 %v992_v15 }
 0x127   : > { %1004 = vmatprep.subr.bf16.mxu1 %v1192_v55 }
 0x129   : > { %954 = vmatmul.mubr.msk.f32.vlgmr.msra.gmra.mrb[0].mxu1 %vm432_vm2, %v230_v16 }
 0x12a   : > { %956 = vmatprep.mubr.msk.f32.mxu1 %vm432_vm2, %v231_v17 }
 0x12d   : > { %957 = vmatmul.mubr.msk.f32.gmra.mrb[2].mxu1 %vm432_vm2, %v232_v18 }
 0x12e   : > { %981 = vmatprep.mubr.msk.f32.mxu1 %vm1193_vm3, %v1194_v56 }
 0x1fc   : > { %v955_v24 = vpop.f32.mrb[0].mxu1 }
 0x1fd   : > { %v517_v25 = vadd.f32 %v955_v24, %v422_v23  ;;  %v511_v27 = vpop.f32.mrb[1].mxu1 }
 0x1fe   : > { %v512_v28 = vadd.f32 %v511_v27, %v418_v21 }
 0x1ff   : > { %v893_v29 = vmul.f32 -1.442695, %v517_v25 }
 0x200   : > { %v892_v31 = vmul.f32 -1.442695, %v512_v28  ;;  %v958_v32 = vpop.f32.mrb[2].mxu1 }
 0x201   : > { %1086 = vpow2.f32 %v893_v29  ;;  %v527_v33 = vadd.f32 %v958_v32, %v430_v30  ;;  %v521_v8 = vpop.f32.mrb[3].mxu1 }
 0x202   : > { %1088 = vpow2.f32 %v892_v31  ;;  %v522_v5 = vadd.f32 %v521_v8, %v426_v22 }
 0x203   : > { %v895_v34 = vmul.f32 -1.442695, %v527_v33 }
 0x204   : > { %v894_v4 = vmul.f32 -1.442695, %v522_v5 }
 0x205   : > { %1090 = vpow2.f32 %v895_v34  ;;  %v778_v34 = vand.u32 2147483648, %v1328_v26 }
 0x206   : > { %1092 = vpow2.f32 %v894_v4 }
 0x20b   : > { %v1087_v7 = vpop.eup %1086 }
 0x20c   : > { %v1089_v35 = vpop.eup %1088  ;;  %v543_v36 = vadd.f32 1.0, %v1087_v7 }
 0x20d   : > { %v542_v37 = vadd.f32 1.0, %v1089_v35 }
 0x20e   : > { %1094 = vrcp.f32 %v543_v36 }
 0x20f   : > { %v1091_v38 = vpop.eup %1090  ;;  %1096 = vrcp.f32 %v542_v37  ;;  %v784_v37 = vlaneseq }
 0x210   : > { %v1093_v39 = vpop.eup %1092  ;;  %v545_v40 = vadd.f32 1.0, %v1091_v38 }
 0x211   : > { %v544_v41 = vadd.f32 1.0, %v1093_v39  ;;  %v785_v39 = vshrl.u32 %v784_v37, 7 }
 0x212   : > { %1098 = vrcp.f32 %v545_v40 }
 0x213   : > { %1100 = vrcp.f32 %v544_v41  ;;  %v786_v41 = vsub.s32 0, %v785_v39 }
 0x218   : > { %v1095_v42 = vpop.eup %1094 }
 0x219   : > { %v1097_v43 = vpop.eup %1096  ;;  %v555_v44 = vmul.f32 %v1095_v42, %v517_v25 }
 0x21a   : > { %v554_v45 = vmul.f32 %v1097_v43, %v512_v28 }
 0x21b   : > { %791 = vst [vmem:[%s1330_s7 + $0x10] sm:$0xff] %v555_v44 }
 0x21c   : > { %v1099_v46 = vpop.eup %1098  ;;  %790 = vst [vmem:[%s1330_s7 + $0x8] sm:$0xff] %v554_v45  ;;  %v996_v47 = vpack.c.bf16 %v555_v44, %v554_v45 }
 0x21d   : > { %v1101_v48 = vpop.eup %1100  ;;  %v557_v49 = vmul.f32 %v1099_v46, %v527_v33  ;;  %v237_v33 = vld [vmem:[%s1447_s1 + $0x60] sm:$0x1] }
 0x21e   : > { %v556_v50 = vmul.f32 %v1101_v48, %v522_v5  ;;  %997 = vmatprep.subr.bf16.mxu0 %v996_v47 }
 0x21f   : > { %793 = vst [vmem:[%s1330_s7 + $0x20] sm:$0xff] %v557_v49  ;;  %999 = vmatpush3.bf16.msra.mxu0 %v996_v47 }
 0x220   : > { %792 = vst [vmem:[%s1330_s7 + $0x18] sm:$0xff] %v556_v50  ;;  %v1000_v51 = vpack.c.bf16 %v557_v49, %v556_v50 }
 0x222   : > { %1001 = vmatprep.subr.bf16.mxu0 %v1000_v51 }
 0x223   : > { %1003 = vmatpush3.bf16.msra.mxu0 %v1000_v51 }
 0x226   : > { %968 = vmatmul.mubr.msk.f32.vlgmr.msra.gmra.mrb[4].mxu0 %vm432_vm2, %v234_v52 }
 0x227   : > { %970 = vmatprep.mubr.msk.f32.mxu0 %vm432_vm2, %v235_v53 }
 0x22a   : > { %971 = vmatmul.mubr.msk.f32.gmra.mrb[6].mxu0 %vm432_vm2, %v236_v54 }
 0x2f9   : > { %v969_v59 = vpop.f32.mrb[4].mxu0 }
 0x2fa   : > { %v658_v60 = vadd.f32 %v969_v59, %v564_v58  ;;  %v652_v61 = vpop.f32.mrb[5].mxu0 }
 0x2fb   : > { %v653_v62 = vadd.f32 %v652_v61, %v560_v57 }
 0x2fc   : > { %v901_v63 = vmul.f32 -1.442695, %v658_v60 }
 0x2fd   : > { %v900_v1 = vmul.f32 -1.442695, %v653_v62  ;;  %v972_v2 = vpop.f32.mrb[6].mxu0 }
 0x2fe   : > { %1102 = vpow2.f32 %v901_v63  ;;  %v668_v6 = vadd.f32 %v972_v2, %v572_v0  ;;  %v662_v9 = vpop.f32.mrb[7].mxu0 }
 0x2ff   : > { %1104 = vpow2.f32 %v900_v1  ;;  %v663_v10 = vadd.f32 %v662_v9, %v568_v3 }
 0x300   : > { %v903_v11 = vmul.f32 -1.442695, %v668_v6 }
 0x301   : > { %v902_v13 = vmul.f32 -1.442695, %v663_v10 }
 0x302   : > { %1106 = vpow2.f32 %v903_v11 }
 0x303   : > { %1108 = vpow2.f32 %v902_v13 }
 0x308   : > { %v1103_v14 = vpop.eup %1102 }
 0x309   : > { %v1105_v15 = vpop.eup %1104  ;;  %v684_v16 = vadd.f32 1.0, %v1103_v14 }
 0x30a   : > { %v683_v17 = vadd.f32 1.0, %v1105_v15 }
 0x30b   : > { %1110 = vrcp.f32 %v684_v16 }
 0x30c   : > { %v1107_v18 = vpop.eup %1106  ;;  %1112 = vrcp.f32 %v683_v17 }
 0x30d   : > { %v1109_v19 = vpop.eup %1108  ;;  %v686_v20 = vadd.f32 1.0, %v1107_v18 }
 0x30e   : > { %v685_v21 = vadd.f32 1.0, %v1109_v19 }
 0x30f   : > { %1114 = vrcp.f32 %v686_v20 }
 0x310   : > { %1116 = vrcp.f32 %v685_v21 }
 0x311   : > { %1118 = vrsqrt.f32 %v1328_v26 }
 0x315   : > { %v1111_v22 = vpop.eup %1110 }
 0x316   : > { %v1113_v23 = vpop.eup %1112  ;;  %v696_v24 = vmul.f32 %v1111_v22, %v658_v60 }
 0x317   : > { %v695_v25 = vmul.f32 %v1113_v23, %v653_v62 }
 0x319   : > { %v1115_v27 = vpop.eup %1114  ;;  %v1005_v28 = vpack.c.bf16 %v696_v24, %v695_v25 }
 0x31a   : > { %v1117_v29 = vpop.eup %1116  ;;  %v698_v30 = vmul.f32 %v1115_v27, %v668_v6 }
 0x31b   : > { %v697_v31 = vmul.f32 %v1117_v29, %v663_v10  ;;  %1006 = vmatpush3.bf16.msra.mxu1 %v1005_v28  ;;  %v1119_v8 = vpop.eup %1118 }
 0x31c   : > { %1007 = vmatprep.subr.bf16.mxu1 %v1192_v55  ;;  %v774_v5 = vmul.f32 %v1119_v8, %v1328_v26 }
 0x31d   : > { %v1008_v32 = vpack.c.bf16 %v698_v30, %v697_v31 }
 0x31e   : > { %v776_v4 = vsel %vm775_vm4, %v1328_v26, %v774_v5 }
 0x31f   : > { %1009 = vmatpush3.bf16.msra.mxu1 %v1008_v32  ;;  %v779_v7 = vsel %vm777_vm5, %v778_v34, %v776_v4 }
 0x320   : > { %v780_v35 = vadd.f32 1e-08, %v779_v7 }
 0x322   : > { %982 = vmatmul.mubr.msk.f32.vlgmr.msra.gmra.mrb[4].mxu1 %vm432_vm2, %v237_v33  ;;  %1120 = vrcp.f32 %v780_v35 }
 0x32c   : > { %v1121_v40 = vpop.eup %1120 }
 0x32d   : > { %v782_v42 = vmul.f32 %v1121_v40, %v1305_v12 }
 0x3f5   : > { %v768_v36 = vpop.f32.mrb[4].mxu1 }
 0x3f6   : > { %1122 = vtanh.f32 %v768_v36  ;;  %v983_v38 = vpop.f32.mrb[5].mxu1 }
 0x400   : > { %v1123_v43 = vpop.eup %1122 }
 0x401   : > { %v787_v26 = vrot.slane %v1123_v43, %v786_v41 }
 0x403   : > { %v788_v44 = vmul.f32 %v787_v26, %v782_v42 }
 0x405   : > { %789 = vst [vmem:[%s1330_s7 + $0x1] sm:$0x7] %v788_v44 }
 0x406   : > { %1137 = shalt.err (!%p1134_p5)
}
 0x407   : > { %s1138_s7 = scalar_lea.hbm %s1401_s20, 640  ;;  %s1142_s30 = scalar_lea.hbm %s1449_s3, 1280 }
 0x408   : > { %p1139_p7 = scmp.ne.s32.totalorder %s1401_s20, %s1138_s7  ;;  %p1143_p12 = scmp.lt.u32.totalorder %s1401_s20, %s1449_s3 }
 0x409   : > { %p1144_p13 = scmp.lt.u32.totalorder %s1142_s30, %s1138_s7  ;;  %p1146_p1 = scmp.lt.u32.totalorder %s1138_s7, %s1401_s20 }
 0x40a   : > { %p1140_p10 = pnand %p1139_p7, %p1257_p6 }
 0x40b   : > { %p1145_p0 = por %p1144_p13, %p1143_p12 }
 0x40c   : > { %p1141_p11 = pneg %p1140_p10 }
 0x40d   : > { %p1147_p2 = por %p1146_p1, %p1145_p0 }
 0x40f   : > { %p1148_p3 = pnand %p1147_p2, %p1141_p11 }
 0x411   : > { %1151 = shalt.err (!%p1148_p3)
}
 0x412   : > { %s1196_s8 = smov 128   ;;  %s1197_s9 = smov 256  }
 0x413   : > { %s1198_s11 = smov 8  }
 0x414   : > { %1013 = dma.vmem_to_hbm [thread:$0]  (%p1257_p6), %s1396_s10, 640, %s1401_s20, %s795_s24, %s1196_s8, %s1197_s9, %s1198_s11  }
 0x415 PF: > { %s822_s17 = sand.u32 1, %s1174_s12   ;;  %p1016_p4 = pnand %p877_p9, %p1261_p8 }
 0x416   : > { %s823_s19 = scalar_lea.sflag [#allocation4], %s822_s17 }
 0x417   : > { %1169 = dma.done.wait (!%p1016_p4), %s823_s19, 640  }
 0x418   : > { %1171 = vsyncadd (!%p1016_p4), %s823_s19, 4294966656  ;;  %p13_p5 = scmp.ge.s32.totalorder %s1242_s18, 4   ;;  %s1452_s12 = smov %s1178_s13 }
 0x419   : > { %s1453_s13 = smov %s1182_s14  ;;  %s1454_s14 = smov %s1255_s21 }
 0x41a   : > { %s1455_s15 = smov %s1242_s18  ;;  %15 = sbr.rel (!%p13_p5) target bundleno = 3 (0x3), region = 110 }
 0x421   :  { %828 = vsyncpa [#allocation4], 1 }
 0x422   :  { %830 = vsyncpa [#allocation4 + $0x1], 1 }

</bundles_post_ra>
